<compile_context>
chip_gen: v7x
topology: tpu7x:2x2x1
jax: 0.10.0
libtpu: 0.0.40
codegen_flags: <defaults>
</compile_context>

<pallas_src>
import functools

import jax
import jax.numpy as jnp
from jax import lax
from jax.experimental import pallas as pl
from jax.experimental.pallas import tpu as pltpu


def _round_up(x: int, m: int) -> int:
    return ((x + m - 1) // m) * m


def _check_binary_adjacency(adj_mat):
    """bf16 operands + the `s != 0` structural mask are only exact for a
    non-negative binary adjacency; guard explicitly (skipped under tracing)."""
    try:
        ok = bool(jnp.all((adj_mat == 0) | (adj_mat == 1)))
    except jax.errors.ConcretizationTypeError:
        return  # traced input: caller's responsibility
    if not ok:
        raise ValueError(
            "EfficientRawSoftmax kernels require a 0/1 adjacency matrix "
            "(bf16 cast and structural-nonzero mask are only exact then).")


# ---------------------------------------------------------------------------
# Kernel 1:  item_sim = masked_softmax( (A^T A) * inv_temperature )
#
# Grid = (item row panels i, user K-blocks k).  The (ti, ip) output panel is
# resident across k (its block index ignores k), so the Gram contraction
# accumulates straight into sim_ref; the masked-softmax epilogue runs once per
# row panel under pl.when(k == last).
# ---------------------------------------------------------------------------
def _sim_kernel(inv_temp, ti, a_ref, sim_ref):
    i = pl.program_id(0)
    k = pl.program_id(1)

    @pl.when(k == 0)
    def _init():
        sim_ref[...] = jnp.zeros_like(sim_ref)

    # Item column panel for this output row panel, sliced out of the resident
    # full-width user panel (start is a multiple of 128 -> no relayout copy).
    a_cols = a_ref[:, pl.ds(pl.multiple_of(i * ti, 128), ti)]
    # (tk, ti) contracted with (tk, ip) over the leading user dim -> (ti, ip).
    # bf16 operands are exact for 0/1 adjacency; accumulate in f32.
    sim_ref[...] += lax.dot_general(
        a_cols,
        a_ref[...],
        dimension_numbers=(((0,), (0,)), ((), ())),
        preferred_element_type=jnp.float32,
    )

    @pl.when(k == pl.num_programs(1) - 1)
    def _finalize():
        s = sim_ref[...]
        # Structural-nonzero mask.  Equivalent to the sparse-structure mask
        # only because the adjacency is non-negative/binary (co-occurrence
        # counts are strictly positive -> no cancellation to spurious zeros).
        mask = s != 0.0
        scaled = s * inv_temp
        neg_inf = jnp.full_like(scaled, -jnp.inf)
        row_max = jnp.max(jnp.where(mask, scaled, neg_inf), axis=-1, keepdims=True)
        row_max = jnp.where(row_max > -jnp.inf, row_max, 0.0)  # empty rows stay 0
        ex = jnp.where(mask, jnp.exp(scaled - row_max), 0.0)
        row_sum = jnp.sum(ex, axis=-1, keepdims=True)
        safe = jnp.where(row_sum == 0.0, 1.0, row_sum)
        # EUP reciprocal seed + two Newton steps -> ~exact f32, no VPU divide.
        r = pl.reciprocal(safe, approx=True)
        r = r * (2.0 - safe * r)
        r = r * (2.0 - safe * r)
        sim_ref[...] = ex * r


def build_item_sim(adj_mat: jax.Array, temperature, *, ti: int = 512,
                   tk: int = 512,
                   vmem_budget_bytes: int = 40 * 1024 * 1024) -> jax.Array:
    """item_sim = masked softmax of (adj^T adj)/temperature -> [n_items, n_items] f32."""
    _check_binary_adjacency(adj_mat)
    n_users, n_items = adj_mat.shape

    ip0 = _round_up(n_items, 128)
    up0 = _round_up(n_users, 128)
    ti = max(128, min((ti // 128) * 128, ip0))
    tk = max(128, min((tk // 128) * 128, up0))
    # Footprint (double-buffered): out panel f32 + adjacency panel bf16.
    # Shrink panels (multiples of 128) until we fit the budget.
    while ti > 128 and ip0 * (8 * ti + 4 * tk) > vmem_budget_bytes:
        ti -= 128
    while tk > 128 and ip0 * (8 * ti + 4 * tk) > vmem_budget_bytes:
        tk -= 128

    ip = _round_up(n_items, ti)
    up = _round_up(n_users, tk)
    # Zero padding is inert for both the Gram matrix and the masked softmax.
    adj_p = jnp.pad(adj_mat.astype(jnp.bfloat16),
                    ((0, up - n_users), (0, ip - n_items)))
    # Temperature is static at setup time (mirrors temperature.item() in the
    # PyTorch module); bake its reciprocal into the kernel as a constant.
    inv_temp = 1.0 / float(temperature)

    sim_p = pl.pallas_call(
        functools.partial(_sim_kernel, inv_temp, ti),
        out_shape=jax.ShapeDtypeStruct((ip, ip), jnp.float32),
        grid_spec=pltpu.PrefetchScalarGridSpec(
            num_scalar_prefetch=0,
            grid=(ip // ti, up // tk),
            in_specs=[
                # Full-width user panel of A; both matmul operands sliced
                # from it, so A makes exactly one HBM pass per row panel.
                pl.BlockSpec((tk, ip), lambda i, k: (k, 0)),
            ],
            out_specs=pl.BlockSpec((ti, ip), lambda i, k: (i, 0)),
        ),
        compiler_params=pltpu.CompilerParams(
            dimension_semantics=("parallel", "arbitrary"),
            vmem_limit_bytes=64 * 1024 * 1024,
        ),
    )(adj_p)
    return sim_p[:n_items, :n_items]


# ---------------------------------------------------------------------------
# Kernel 2:  scores = user_profiles @ item_sim
# Grid = (B tiles i, N tiles j, K tiles k).  The bf16 LHS strip (bm, ip) is
# K-resident (fetched once per batch tile); output accumulated in-place.
# ---------------------------------------------------------------------------
def _scores_kernel(t_i, p_ref, sim_ref, o_ref):
    k = pl.program_id(2)

    @pl.when(k == 0)
    def _init():
        o_ref[...] = jnp.zeros_like(o_ref)

    p_blk = p_ref[:, pl.ds(pl.multiple_of(k * t_i, 128), t_i)]
    o_ref[...] += jnp.dot(p_blk.astype(jnp.float32), sim_ref[...],
                          preferred_element_type=jnp.float32)


def efficient_raw_softmax_forward(adj_mat: jax.Array, item_sim: jax.Array,
                                  users: jax.Array, *, bm: int = 256,
                                  t_i: int = 512,
                                  vmem_budget_bytes: int = 32 * 1024 * 1024
                                  ) -> jax.Array:
    """scores = adj_mat[users] @ item_sim -> [batch, n_items] f32."""
    _, n_items = adj_mat.shape
    # Row gather in plain JAX (one XLA gather of [B, n_items]), streamed to
    # the kernel in bf16 (exact for 0/1 adjacency, half the HBM bytes).
    user_profiles = jnp.take(adj_mat.astype(jnp.bfloat16), users, axis=0)
    b = user_profiles.shape[0]

    ip0 = _round_up(n_items, 128)
    t_i = max(128, min((t_i // 128) * 128, ip0))
    bm = min(bm, _round_up(b, 8))
    # Footprint (double-buffered): bf16 LHS strip + f32 sim tile + f32 out tile.
    while bm > 8 and (4 * bm * ip0 + 8 * t_i * t_i + 8 * bm * t_i) > vmem_budget_bytes:
        bm = max(8, (bm // 16) * 8)

    bp = _round_up(b, bm)
    ip = _round_up(n_items, t_i)
    p_p = jnp.pad(user_profiles, ((0, bp - b), (0, ip - n_items)))
    sim_p = jnp.pad(item_sim, ((0, ip - n_items), (0, ip - n_items)))

    out = pl.pallas_call(
        functools.partial(_scores_kernel, t_i),
        out_shape=jax.ShapeDtypeStruct((bp, ip), jnp.float32),
        grid_spec=pltpu.PrefetchScalarGridSpec(
            num_scalar_prefetch=0,
            grid=(bp // bm, ip // t_i, ip // t_i),
            in_specs=[
                # K-resident LHS strip: fetched once per batch tile i.
                pl.BlockSpec((bm, ip), lambda i, j, k: (i, 0)),
                pl.BlockSpec((t_i, t_i), lambda i, j, k: (k, j)),
            ],
            out_specs=pl.BlockSpec((bm, t_i), lambda i, j, k: (i, j)),
        ),
        compiler_params=pltpu.CompilerParams(
            dimension_semantics=("parallel", "parallel", "arbitrary"),
            vmem_limit_bytes=64 * 1024 * 1024,
        ),
    )(p_p, sim_p)
    return out[:b, :n_items]


# ---------------------------------------------------------------------------
# Pure-JAX reference for a correctness check
# ---------------------------------------------------------------------------
def _reference(adj_mat, users, temperature):
    a = adj_mat.astype(jnp.float32)
    s = jnp.dot(a.T, a, precision=lax.Precision.HIGHEST)
    mask = s != 0.0
    scaled = s / temperature
    row_max = jnp.max(jnp.where(mask, scaled, -jnp.inf), axis=-1, keepdims=True)
    row_max = jnp.where(row_max > -jnp.inf, row_max, 0.0)
    ex = jnp.where(mask, jnp.exp(scaled - row_max), 0.0)
    row_sum = jnp.sum(ex, axis=-1, keepdims=True)
    sim = ex / jnp.where(row_sum == 0.0, 1.0, row_sum)
    return jnp.dot(a[users], sim, precision=lax.Precision.HIGHEST)


if __name__ == "__main__":
    key = jax.random.PRNGKey(0)

    n_users, n_items, batch = 16, 32, 8
    temperature = 0.7  # nn.Parameter init value (static at setup, like .item())

    # Deterministic synthetic binary user-item adjacency matrix.
    adj_mat = jax.random.bernoulli(key, p=0.3, shape=(n_users, n_items)).astype(
        jnp.float32
    )
    users = jnp.array([0, 2, 4, 6, 8, 10, 12, 15], dtype=jnp.int32)

    # Setup (item_sim with sparse-structure softmax) + forward.
    item_sim = build_item_sim(adj_mat, temperature)
    scores = efficient_raw_softmax_forward(adj_mat, item_sim, users)
    scores = jax.block_until_ready(scores)

    assert scores.shape == (batch, n_items)
    assert scores.dtype == jnp.float32

    ref = _reference(adj_mat, users, temperature)
    assert jnp.allclose(scores, ref, atol=1e-5, rtol=1e-5), "mismatch vs reference"

    print("KERNEL_OK")
</pallas_src>

<mosaic_0001>
module attributes {stable_mosaic.version = 11 : i64} {
  func.func @_sim_kernel(%arg0: i32, %arg1: i32, %arg2: memref<128x128xbf16, #tpu.memory_space<vmem>>, %arg3: memref<128x128xf32, #tpu.memory_space<vmem>>) attributes {dimension_semantics = [#tpu.dimension_semantics<parallel>, #tpu.dimension_semantics<arbitrary>], iteration_bounds = array<i64: 1, 1>, scalar_prefetch = 0 : i64, scratch_operands = 0 : i64, tpu.core_type = #tpu.core_type<tc>, window_params = [{transform_indices = @transform_0, window_bounds = array<i64: 128, 128>}, {transform_indices = @transform_1, window_bounds = array<i64: 128, 128>}]} {
    %c0_i32 = arith.constant 0 : i32
    %0 = arith.cmpi eq, %arg1, %c0_i32 : i32
    %1 = arith.extui %0 : i1 to i32
    %c0_i32_0 = arith.constant 0 : i32
    %2 = arith.cmpi ne, %1, %c0_i32_0 : i32
    scf.if %2 {
      %cst_9 = arith.constant 0.000000e+00 : f32
      %15 = vector.broadcast %cst_9 : f32 to vector<128x128xf32>
      %c0_10 = arith.constant 0 : index
      %c0_11 = arith.constant 0 : index
      %16 = vector.load %arg3[%c0_10, %c0_11] : memref<128x128xf32, #tpu.memory_space<vmem>>, vector<128x128xf32>
      tpu.vector_store %arg3[%c0_10, %c0_11], %15 {strides = array<i32>} : memref<128x128xf32, #tpu.memory_space<vmem>>, vector<128x128xf32>,
    } else {
    }
    %c128_i32 = arith.constant 128 : i32
    %3 = arith.muli %arg0, %c128_i32 : i32
    %4 = tpu.assume_multiple %3, 128 : i32
    %c0 = arith.constant 0 : index
    %5 = arith.index_cast %4 : i32 to index
    %6 = vector.load %arg2[%c0, %5] : memref<128x128xbf16, #tpu.memory_space<vmem>>, vector<128x128xbf16>
    %c0_1 = arith.constant 0 : index
    %c0_2 = arith.constant 0 : index
    %7 = vector.load %arg3[%c0_1, %c0_2] : memref<128x128xf32, #tpu.memory_space<vmem>>, vector<128x128xf32>
    %c0_3 = arith.constant 0 : index
    %c0_4 = arith.constant 0 : index
    %8 = vector.load %arg2[%c0_3, %c0_4] : memref<128x128xbf16, #tpu.memory_space<vmem>>, vector<128x128xbf16>
    %cst = arith.constant dense<0.000000e+00> : vector<128x128xf32>
    %9 = tpu.matmul %6, %8, %cst {dimension_numbers = #tpu.dot_dimension_numbers<[0], [0], [1], [1], [0, 1, 1, 1], [], []>} : vector<128x128xbf16>, vector<128x128xbf16>, vector<128x128xf32> -> vector<128x128xf32>
    %10 = arith.addf %7, %9 : vector<128x128xf32>
    %c0_5 = arith.constant 0 : index
    %c0_6 = arith.constant 0 : index
    %11 = vector.load %arg3[%c0_5, %c0_6] : memref<128x128xf32, #tpu.memory_space<vmem>>, vector<128x128xf32>
    tpu.vector_store %arg3[%c0_5, %c0_6], %10 {strides = array<i32>} : memref<128x128xf32, #tpu.memory_space<vmem>>, vector<128x128xf32>,
    %c0_i32_7 = arith.constant 0 : i32
    %12 = arith.cmpi eq, %arg1, %c0_i32_7 : i32
    %13 = arith.extui %12 : i1 to i32
    %c0_i32_8 = arith.constant 0 : i32
    %14 = arith.cmpi ne, %13, %c0_i32_8 : i32
    scf.if %14 {
      %c0_9 = arith.constant 0 : index
      %c0_10 = arith.constant 0 : index
      %15 = vector.load %arg3[%c0_9, %c0_10] : memref<128x128xf32, #tpu.memory_space<vmem>>, vector<128x128xf32>
      %cst_11 = arith.constant 0.000000e+00 : f32
      %16 = vector.broadcast %cst_11 : f32 to vector<128x128xf32>
      %17 = arith.cmpf one, %15, %16 : vector<128x128xf32>
      %cst_12 = arith.constant 1.42857146 : f32
      %18 = vector.broadcast %cst_12 : f32 to vector<128x128xf32>
      %19 = arith.mulf %15, %18 : vector<128x128xf32>
      %cst_13 = arith.constant 0xFF800000 : f32
      %20 = vector.broadcast %cst_13 : f32 to vector<128x128xf32>
      %21 = arith.select %17, %19, %20 : vector<128x128xi1>, vector<128x128xf32>
      %cst_14 = arith.constant dense<0xFF800000> : vector<128xf32>
      %22 = vector.multi_reduction <maximumf>, %21, %cst_14 [1] : vector<128x128xf32> to vector<128xf32>
      %23 = vector.shape_cast %22 : vector<128xf32> to vector<128x1xf32>
      %cst_15 = arith.constant 0xFF800000 : f32
      %24 = vector.broadcast %cst_15 : f32 to vector<128x1xf32>
      %25 = arith.cmpf ogt, %23, %24 : vector<128x1xf32>
      %cst_16 = arith.constant 0.000000e+00 : f32
      %26 = vector.broadcast %cst_16 : f32 to vector<128x1xf32>
      %27 = arith.select %25, %23, %26 : vector<128x1xi1>, vector<128x1xf32>
      %28 = vector.broadcast %27 : vector<128x1xf32> to vector<128x128xf32>
      %29 = arith.subf %19, %28 : vector<128x128xf32>
      %30 = math.exp %29 : vector<128x128xf32>
      %cst_17 = arith.constant 0.000000e+00 : f32
      %31 = vector.broadcast %cst_17 : f32 to vector<128x128xf32>
      %32 = arith.select %17, %30, %31 : vector<128x128xi1>, vector<128x128xf32>
      %cst_18 = arith.constant dense<0.000000e+00> : vector<128xf32>
      %33 = vector.multi_reduction <add>, %32, %cst_18 [1] : vector<128x128xf32> to vector<128xf32>
      %34 = vector.shape_cast %33 : vector<128xf32> to vector<128x1xf32>
      %cst_19 = arith.constant 0.000000e+00 : f32
      %35 = vector.broadcast %cst_19 : f32 to vector<128x1xf32>
      %36 = arith.cmpf oeq, %34, %35 : vector<128x1xf32>
      %cst_20 = arith.constant 1.000000e+00 : f32
      %37 = vector.broadcast %cst_20 : f32 to vector<128x1xf32>
      %38 = arith.select %36, %37, %34 : vector<128x1xi1>, vector<128x1xf32>
      %39 = tpu.reciprocal %38 {approx = true} : vector<128x1xf32> -> vector<128x1xf32>
      %40 = arith.mulf %38, %39 : vector<128x1xf32>
      %cst_21 = arith.constant 2.000000e+00 : f32
      %41 = vector.broadcast %cst_21 : f32 to vector<128x1xf32>
      %42 = arith.subf %41, %40 : vector<128x1xf32>
      %43 = arith.mulf %39, %42 : vector<128x1xf32>
      %44 = arith.mulf %38, %43 : vector<128x1xf32>
      %cst_22 = arith.constant 2.000000e+00 : f32
      %45 = vector.broadcast %cst_22 : f32 to vector<128x1xf32>
      %46 = arith.subf %45, %44 : vector<128x1xf32>
      %47 = arith.mulf %43, %46 : vector<128x1xf32>
      %48 = vector.broadcast %47 : vector<128x1xf32> to vector<128x128xf32>
      %49 = arith.mulf %32, %48 : vector<128x128xf32>
      %c0_23 = arith.constant 0 : index
      %c0_24 = arith.constant 0 : index
      %50 = vector.load %arg3[%c0_23, %c0_24] : memref<128x128xf32, #tpu.memory_space<vmem>>, vector<128x128xf32>
      tpu.vector_store %arg3[%c0_23, %c0_24], %49 {strides = array<i32>} : memref<128x128xf32, #tpu.memory_space<vmem>>, vector<128x128xf32>,
    } else {
    }
    return
  }
  func.func @transform_0(%arg0: i32, %arg1: i32) -> (i32, i32) {
    %c0_i32 = arith.constant 0 : i32
    %c0_i32_0 = arith.constant 0 : i32
    return %arg1, %c0_i32 : i32, i32
  }
  func.func @transform_1(%arg0: i32, %arg1: i32) -> (i32, i32) {
    %c0_i32 = arith.constant 0 : i32
    %c0_i32_0 = arith.constant 0 : i32
    return %arg0, %c0_i32 : i32, i32
  }
}

</mosaic_0001>

<bundles_post_ra>
// kernel: tpu_custom_call.1
= control target key start
LH: loop header
LB: loop body
LE: loop exit
PB: predicated region body
PF: predicated region fallthrough
CT: control target
= control target key end

     0   :  { %6 = vsyncpa [#allocation3], 0  ;;  %s1311_s0 = inlined_call_operand.hbm [shape: bf16[128,128], index: 0, kind: input, shape index: {}]   ;;  %s1312_s1 = inlined_call_operand.hbm [shape: f32[128,128], index: 1, kind: output, shape index: {}]  }
   0x1   :  { %7 = vsyncpa [#allocation4], 0  ;;  %s975_s6 = smov [#allocation2]   ;;  %s927_s10 = scalar_lea.hbm %s1311_s0, 1024 }
   0x2   :  { %s13_s7 = sshll.u32 %s975_s6, 4  ;;  %p928_p0 = scmp.ne.s32.totalorder %s1311_s0, %s927_s10  ;;  %s14_s7 = int_to_ptr.vmem [resolvable:$true] %s13_s7 }
   0x3   :  { %p931_p1 = scmp.lt.u32.totalorder %s927_s10, %s1311_s0 }
   0x5   :  { %p933_p2 = pnand %p931_p1, %p928_p0 }
   0x7   :  { %936 = shalt.err (!%p933_p2)
}
   0x8   :  { %s937_s15 = scalar_lea.vmem %s14_s7, 1024  ;;  %p942_p4 = scmp.lt.s32.totalorder %s14_s7, %s14_s7 }
   0x9   :  { %p938_p3 = scmp.ne.s32.totalorder %s14_s7, %s937_s15  ;;  %p943_p5 = scmp.lt.s32.totalorder %s937_s15, %s937_s15 }
   0xb   :  { %p944_p6 = por %p943_p5, %p942_p4 }
   0xd   :  { %p945_p7 = pnand %p944_p6, %p938_p3 }
   0xf   :  { %948 = shalt.err (!%p945_p7)
}
  0x10   :  { %s976_s16 = smov 64   ;;  %s977_s17 = smov 4  }
  0x11   :  { %19 = dma.hbm_to_vmem [thread:$0]  %s1311_s0, 1024, %s14_s7, [#allocation3], %s976_s16, %s976_s16, %s977_s17  }
  0x12   :  { %971 = dma.done.wait [#allocation3], 1024  }
  0x13   :  { %972 = vsyncadd [#allocation3], 4294966272  ;;  %v847_v0 = vld [vmem:[#allocation2] sm:$0xff]   ;;  %v848_v1 = vld [vmem:[#allocation2 + $0x8] sm:$0xff]   ;;  %s978_s0 = smov [#allocation5]  }
  0x14   :  { %145 = vxpose.xlu0.c.b16.start [1/8] %v847_v0, 128  ;;  %v849_v2 = vld [vmem:[#allocation2 + $0x10] sm:$0xff]   ;;  %v855_v3 = vld [vmem:[#allocation2] sm:$0xff]   ;;  %v856_v4 = vld [vmem:[#allocation2 + $0x8] sm:$0xff]   ;;  %s746_s20 = sshll.u32 %s978_s0, 4  ;;  %s747_s20 = int_to_ptr.vmem [resolvable:$true] %s746_s20 }
  0x15   :  { %v850_v5 = vld [vmem:[#allocation2 + $0x18] sm:$0xff]   ;;  %792 = vmatprep.subr.bf16.mxu0 %v855_v3  ;;  %824 = vmatprep.subr.bf16.mxu1 %v855_v3  ;;  %v857_v6 = vld [vmem:[#allocation2 + $0x10] sm:$0xff]   ;;  %v851_v7 = vld [vmem:[#allocation2 + $0x20] sm:$0xff]   ;;  %s949_s21 = scalar_lea.vmem %s747_s20, 2048  ;;  %p954_p9 = scmp.lt.s32.totalorder %s747_s20, %s747_s20 }
  0x16   :  { %793 = vmatpush3.bf16.msra.mxu0 %v855_v3  ;;  %832 = vmatpush3.bf16.msra.mxu1 %v855_v3  ;;  %v858_v8 = vld [vmem:[#allocation2 + $0x18] sm:$0xff]   ;;  %v852_v9 = vld [vmem:[#allocation2 + $0x28] sm:$0xff]   ;;  %v859_v10 = vld [vmem:[#allocation2 + $0x20] sm:$0xff]   ;;  %p950_p8 = scmp.ne.s32.totalorder %s747_s20, %s949_s21  ;;  %p955_p10 = scmp.lt.s32.totalorder %s949_s21, %s949_s21 }
  0x17   :  { %794 = vmatprep.subr.bf16.mxu0 %v856_v4  ;;  %825 = vmatprep.subr.bf16.mxu1 %v856_v4  ;;  %v853_v11 = vld [vmem:[#allocation2 + $0x30] sm:$0xff]   ;;  %v860_v12 = vld [vmem:[#allocation2 + $0x28] sm:$0xff]   ;;  %v854_v13 = vld [vmem:[#allocation2 + $0x38] sm:$0xff]  }
  0x18   :  { %146 = vxpose.xlu0.c.b16.cont [2/8] %v848_v1, 128  ;;  %v861_v14 = vld [vmem:[#allocation2 + $0x30] sm:$0xff]   ;;  %v862_v15 = vld [vmem:[#allocation2 + $0x38] sm:$0xff]   ;;  %p956_p11 = por %p955_p10, %p954_p9 }
  0x1a   :  { %795 = vmatpush3.bf16.msra.mxu0 %v856_v4  ;;  %833 = vmatpush3.bf16.msra.mxu1 %v856_v4  ;;  %p957_p12 = pnand %p956_p11, %p950_p8 }
  0x1b   :  { %796 = vmatprep.subr.bf16.mxu0 %v857_v6  ;;  %826 = vmatprep.subr.bf16.mxu1 %v857_v6 }
  0x1c   :  { %147 = vxpose.xlu0.c.b16.cont [3/8] %v849_v2, 128 }
  0x1e   :  { %797 = vmatpush3.bf16.msra.mxu0 %v857_v6  ;;  %834 = vmatpush3.bf16.msra.mxu1 %v857_v6 }
  0x1f   :  { %798 = vmatprep.subr.bf16.mxu0 %v858_v8  ;;  %827 = vmatprep.subr.bf16.mxu1 %v858_v8 }
  0x20   :  { %148 = vxpose.xlu0.c.b16.cont [4/8] %v850_v5, 128 }
  0x22   :  { %799 = vmatpush3.bf16.msra.mxu0 %v858_v8  ;;  %835 = vmatpush3.bf16.msra.mxu1 %v858_v8 }
  0x23   :  { %800 = vmatprep.subr.bf16.mxu0 %v859_v10  ;;  %828 = vmatprep.subr.bf16.mxu1 %v859_v10 }
  0x24   :  { %149 = vxpose.xlu0.c.b16.cont [5/8] %v851_v7, 128 }
  0x26   :  { %801 = vmatpush3.bf16.msra.mxu0 %v859_v10  ;;  %836 = vmatpush3.bf16.msra.mxu1 %v859_v10 }
  0x27   :  { %802 = vmatprep.subr.bf16.mxu0 %v860_v12  ;;  %829 = vmatprep.subr.bf16.mxu1 %v860_v12 }
  0x28   :  { %150 = vxpose.xlu0.c.b16.cont [6/8] %v852_v9, 128 }
  0x2a   :  { %803 = vmatpush3.bf16.msra.mxu0 %v860_v12  ;;  %837 = vmatpush3.bf16.msra.mxu1 %v860_v12 }
  0x2b   :  { %804 = vmatprep.subr.bf16.mxu0 %v861_v14  ;;  %830 = vmatprep.subr.bf16.mxu1 %v861_v14 }
  0x2c   :  { %151 = vxpose.xlu0.c.b16.cont [7/8] %v853_v11, 128 }
  0x2e   :  { %805 = vmatpush3.bf16.msra.mxu0 %v861_v14  ;;  %838 = vmatpush3.bf16.msra.mxu1 %v861_v14 }
  0x2f   :  { %806 = vmatprep.subr.bf16.mxu0 %v862_v15  ;;  %831 = vmatprep.subr.bf16.mxu1 %v862_v15 }
  0x30   :  { %152 = vxpose.xlu0.c.b16.end [8/8] %v854_v13, 128 }
  0x32   :  { %807 = vmatpush3.bf16.msra.mxu0 %v862_v15  ;;  %839 = vmatpush3.bf16.msra.mxu1 %v862_v15 }
  0x7a   :  { %v153_v16 = vpop.trf.xlu0 }
  0x7b   :  { %808 = vmatprep.mubr.bf16.mxu0 %v153_v16 }
  0x7e   :  { %v154_v17 = vpop.trf.xlu0 }
  0x7f   :  { %809 = vmatmul.mubr.bf16.vlgmr.msra.gmra.mrb[0].mxu0 %v154_v17 }
  0x82   :  { %v155_v18 = vpop.trf.xlu0 }
  0x83   :  { %812 = vmatprep.mubr.bf16.mxu0 %v155_v18 }
  0x86   :  { %v156_v19 = vpop.trf.xlu0 }
  0x87   :  { %813 = vmatmul.mubr.bf16.gmra.mrb[4].mxu0 %v156_v19 }
  0x8a   :  { %v157_v20 = vpop.trf.xlu0 }
  0x8b   :  { %816 = vmatprep.mubr.bf16.mxu1 %v157_v20 }
  0x8e   :  { %v158_v21 = vpop.trf.xlu0 }
  0x8f   :  { %817 = vmatmul.mubr.bf16.vlgmr.msra.gmra.mrb[0].mxu1 %v158_v21 }
  0x92   :  { %v159_v22 = vpop.trf.xlu0 }
  0x93   :  { %820 = vmatprep.mubr.bf16.mxu1 %v159_v22 }
  0x96   :  { %v160_v23 = vpop.trf.xlu0 }
  0x97   :  { %821 = vmatmul.mubr.bf16.gmra.mrb[4].mxu1 %v160_v23 }
 0x152   :  { %v1003_v24 = vpop.f32.mrb[0].mxu0 }
 0x153   :  { %v1005_v25 = vpop.f32.mrb[1].mxu0  ;;  %vm359_vm0 = vcmp.ne.f32.partialorder %v1003_v24, 0.0  ;;  %v1013_v28 = vmul.f32 1.4285715, %v1003_v24 }
 0x154   :  { %v1007_v26 = vpop.f32.mrb[2].mxu0  ;;  %v1019_v30 = vmul.f32 1.4285715, %v1005_v25  ;;  %vm357_vm1 = vcmp.ne.f32.partialorder %v1005_v25, 0.0 }
 0x155   :  { %v1009_v27 = vpop.f32.mrb[3].mxu0  ;;  %v391_v29 = vsel %vm359_vm0, %v1013_v28, -inf  ;;  %v1030_v34 = vmul.f32 1.4285715, %v1007_v26  ;;  %vm360_vm2 = vcmp.ne.f32.partialorder %v1007_v26, 0.0 }
 0x156   :  { %409 = vmax.xlane.f32.xlu1 %v391_v29  ;;  %v389_v33 = vsel %vm357_vm1, %v1019_v30, -inf  ;;  %v1041_v38 = vmul.f32 1.4285715, %v1009_v27  ;;  %vm358_vm3 = vcmp.ne.f32.partialorder %v1009_v27, 0.0 }
 0x157   :  { %v392_v37 = vsel %vm360_vm2, %v1030_v34, -inf }
 0x158   :  { %v390_v42 = vsel %vm358_vm3, %v1041_v38, -inf }
 0x15a   :  { %v1022_v31 = vpop.f32.mrb[4].mxu0  ;;  %405 = vmax.xlane.f32.xlu1 %v389_v33 }
 0x15b   :  { %v1024_v32 = vpop.f32.mrb[5].mxu0  ;;  %v1045_v39 = vmul.f32 1.4285715, %v1022_v31  ;;  %vm363_vm4 = vcmp.ne.f32.partialorder %v1022_v31, 0.0 }
 0x15c   :  { %v1032_v35 = vpop.f32.mrb[6].mxu0  ;;  %v1067_v47 = vmul.f32 1.4285715, %v1024_v32  ;;  %vm361_vm6 = vcmp.ne.f32.partialorder %v1024_v32, 0.0 }
 0x15d   :  { %v1035_v36 = vpop.f32.mrb[7].mxu0  ;;  %v395_v45 = vsel %vm363_vm4, %v1045_v39, -inf  ;;  %v1081_v52 = vmul.f32 1.4285715, %v1032_v35  ;;  %vm364_vm7 = vcmp.ne.f32.partialorder %v1032_v35, 0.0 }
 0x15e   :  { %411 = vmax.xlane.f32.xlu1 %v392_v37  ;;  %v393_v51 = vsel %vm361_vm6, %v1067_v47, -inf  ;;  %v1092_v56 = vmul.f32 1.4285715, %v1035_v36  ;;  %vm362_vm9 = vcmp.ne.f32.partialorder %v1035_v36, 0.0 }
 0x15f   :  { %v396_v55 = vsel %vm364_vm7, %v1081_v52, -inf }
 0x160   :  { %v394_v61 = vsel %vm362_vm9, %v1092_v56, -inf }
 0x162   :  { %v1047_v40 = vpop.f32.mrb[0].mxu1  ;;  %407 = vmax.xlane.f32.xlu1 %v390_v42 }
 0x163   :  { %v1050_v41 = vpop.f32.mrb[1].mxu1  ;;  %v1104_v59 = vmul.f32 1.4285715, %v1047_v40  ;;  %vm367_vm11 = vcmp.ne.f32.partialorder %v1047_v40, 0.0 }
 0x164   :  { %v1055_v43 = vpop.f32.mrb[2].mxu1  ;;  %vm365_vm5 = vcmp.ne.f32.partialorder %v1050_v41, 0.0  ;;  %v1064_v46 = vmul.f32 1.4285715, %v1050_v41 }
 0x165   :  { %v1057_v44 = vpop.f32.mrb[3].mxu1  ;;  %v399_v63 = vsel %vm367_vm11, %v1104_v59, -inf  ;;  %v1120_v0 = vmul.f32 1.4285715, %v1055_v43  ;;  %vm368_vm12 = vcmp.ne.f32.partialorder %v1055_v43, 0.0 }
 0x166   :  { %417 = vmax.xlane.f32.xlu1 %v395_v45  ;;  %v397_v48 = vsel %vm365_vm5, %v1064_v46, -inf  ;;  %v1127_v2 = vmul.f32 1.4285715, %v1057_v44  ;;  %vm366_vm13 = vcmp.ne.f32.partialorder %v1057_v44, 0.0 }
 0x167   :  { %421 = vmax.xlane.f32.xlu0 %v397_v48  ;;  %v400_v1 = vsel %vm368_vm12, %v1120_v0, -inf }
 0x168   :  { %v398_v3 = vsel %vm366_vm13, %v1127_v2, -inf }
 0x16a   :  { %v1073_v49 = vpop.f32.mrb[4].mxu1  ;;  %413 = vmax.xlane.f32.xlu1 %v393_v51 }
 0x16b   :  { %v1075_v50 = vpop.f32.mrb[5].mxu1  ;;  %v1141_v6 = vmul.f32 1.4285715, %v1073_v49  ;;  %vm1316_vm15 = vcmp.ne.f32.partialorder %v1073_v49, 0.0 }
 0x16c   :  { %v1083_v53 = vpop.f32.mrb[6].mxu1  ;;  %v1134_v4 = vmul.f32 1.4285715, %v1075_v50  ;;  %vm1315_vm14 = vcmp.ne.f32.partialorder %v1075_v50, 0.0 }
 0x16d   :  { %v1086_v54 = vpop.f32.mrb[7].mxu1  ;;  %v1100_v58 = vmul.f32 1.4285715, %v1083_v53  ;;  %vm1313_vm10 = vcmp.ne.f32.partialorder %v1083_v53, 0.0  ;;  %v403_v7 = vsel %vm1316_vm15, %v1141_v6, -inf }
 0x16e   :  { %419 = vmax.xlane.f32.xlu1 %v396_v55  ;;  %vm1314_vm8 = vcmp.ne.f32.partialorder %v1086_v54, 0.0  ;;  %v1096_v57 = vmul.f32 1.4285715, %v1086_v54  ;;  %v401_v5 = vsel %vm1315_vm14, %v1134_v4, -inf }
 0x16f   :  { %v404_v62 = vsel %vm1313_vm10, %v1100_v58, -inf }
 0x170   :  { %v402_v60 = vsel %vm1314_vm8, %v1096_v57, -inf }
 0x171   :  { %431 = vmax.xlane.f32.xlu0 %v402_v60 }
 0x172   :  { %415 = vmax.xlane.f32.xlu1 %v394_v61 }
 0x175   :  { %435 = vmax.xlane.f32.xlu0 %v404_v62 }
 0x176   :  { %425 = vmax.xlane.f32.xlu1 %v399_v63 }
 0x17a   :  { %427 = vmax.xlane.f32.xlu1 %v400_v1 }
 0x17e   :  { %423 = vmax.xlane.f32.xlu1 %v398_v3 }
 0x182   :  { %429 = vmax.xlane.f32.xlu1 %v401_v5 }
 0x186   :  { %433 = vmax.xlane.f32.xlu1 %v403_v7 }
 0x1e3   :  { %v410_v8 = vpop.xlane.xlu1 %409 }
 0x1e4   :  { %vm439_vm10 = vcmp.gt.f32.partialorder %v410_v8, -inf }
 0x1e5   :  { %v455_v9 = vsel %vm439_vm10, %v410_v8, 0.0 }
 0x1e6   :  { %v471_v10 = vsub.f32 %v1013_v28, %v455_v9 }
 0x1e7   :  { %v406_v11 = vpop.xlane.xlu1 %405 }
 0x1e8   :  { %v489_v12 = vmul.f32 1.442695, %v471_v10  ;;  %vm437_vm8 = vcmp.gt.f32.partialorder %v406_v11, -inf }
 0x1e9   :  { %v453_v13 = vsel %vm437_vm8, %v406_v11, 0.0 }
 0x1ea   :  { %863 = vpow2.f32 %v489_v12  ;;  %v469_v14 = vsub.f32 %v1019_v30, %v453_v13 }
 0x1eb   :  { %v412_v15 = vpop.xlane.xlu1 %411 }
 0x1ec   :  { %v485_v16 = vmul.f32 1.442695, %v469_v14  ;;  %vm440_vm14 = vcmp.gt.f32.partialorder %v412_v15, -inf }
 0x1ed   :  { %v456_v17 = vsel %vm440_vm14, %v412_v15, 0.0 }
 0x1ee   :  { %865 = vpow2.f32 %v485_v16  ;;  %v472_v18 = vsub.f32 %v1030_v34, %v456_v17 }
 0x1ef   :  { %v408_v19 = vpop.xlane.xlu1 %407 }
 0x1f0   :  { %v491_v20 = vmul.f32 1.442695, %v472_v18  ;;  %vm438_vm15 = vcmp.gt.f32.partialorder %v408_v19, -inf }
 0x1f1   :  { %v454_v21 = vsel %vm438_vm15, %v408_v19, 0.0 }
 0x1f2   :  { %867 = vpow2.f32 %v491_v20  ;;  %v470_v22 = vsub.f32 %v1041_v38, %v454_v21 }
 0x1f3   :  { %v418_v23 = vpop.xlane.xlu1 %417 }
 0x1f4   :  { %v864_v28 = vpop.eup %863  ;;  %v487_v29 = vmul.f32 1.442695, %v470_v22  ;;  %vm443_vm8 = vcmp.gt.f32.partialorder %v418_v23, -inf  ;;  %v422_v24 = vpop.xlane.xlu0 %421 }
 0x1f5   :  { %v459_v33 = vsel %vm443_vm8, %v418_v23, 0.0  ;;  %v1153_v30 = vsel %vm359_vm0, %v864_v28, 0.0  ;;  %vm445_vm14 = vcmp.gt.f32.partialorder %v422_v24, -inf }
 0x1f6   :  { %869 = vpow2.f32 %v487_v29  ;;  %v475_v37 = vsub.f32 %v1045_v39, %v459_v33  ;;  %537 = vadd.xlane.f32.xlu1 %v1153_v30  ;;  %v461_v3 = vsel %vm445_vm14, %v422_v24, 0.0 }
 0x1f7   :  { %v414_v34 = vpop.xlane.xlu1 %413  ;;  %v477_v10 = vsub.f32 %v1064_v46, %v461_v3 }
 0x1f8   :  { %v866_v42 = vpop.eup %865  ;;  %v497_v45 = vmul.f32 1.442695, %v475_v37  ;;  %vm441_vm10 = vcmp.gt.f32.partialorder %v414_v34, -inf }
 0x1f9   :  { %v457_v48 = vsel %vm441_vm10, %v414_v34, 0.0  ;;  %v1159_v38 = vsel %vm357_vm1, %v866_v42, 0.0  ;;  %v501_v16 = vmul.f32 1.442695, %v477_v10 }
 0x1fa   :  { %871 = vpow2.f32 %v497_v45  ;;  %v473_v51 = vsub.f32 %v1067_v47, %v457_v48  ;;  %533 = vadd.xlane.f32.xlu1 %v1159_v38 }
 0x1fb   :  { %v420_v55 = vpop.xlane.xlu1 %419 }
 0x1fc   :  { %v868_v60 = vpop.eup %867  ;;  %v493_v39 = vmul.f32 1.442695, %v473_v51  ;;  %vm444_vm0 = vcmp.gt.f32.partialorder %v420_v55, -inf }
 0x1fd   :  { %v460_v61 = vsel %vm444_vm0, %v420_v55, 0.0  ;;  %v1165_v62 = vsel %vm360_vm2, %v868_v60, 0.0 }
 0x1fe   :  { %873 = vpow2.f32 %v493_v39  ;;  %v476_v25 = vsub.f32 %v1081_v52, %v460_v61  ;;  %539 = vadd.xlane.f32.xlu0 %v1165_v62  ;;  %v432_v5 = vpop.xlane.xlu0 %431 }
 0x1ff   :  { %v416_v63 = vpop.xlane.xlu1 %415  ;;  %vm450_vm15 = vcmp.gt.f32.partialorder %v432_v5, -inf }
 0x200   :  { %v870_v47 = vpop.eup %869  ;;  %v499_v1 = vmul.f32 1.442695, %v476_v25  ;;  %vm442_vm1 = vcmp.gt.f32.partialorder %v416_v63, -inf  ;;  %v466_v46 = vsel %vm450_vm15, %v432_v5, 0.0 }
 0x201   :  { %v458_v7 = vsel %vm442_vm1, %v416_v63, 0.0  ;;  %v1171_v8 = vsel %vm358_vm3, %v870_v47, 0.0  ;;  %v482_v21 = vsub.f32 %v1096_v57, %v466_v46 }
 0x202   :  { %875 = vpow2.f32 %v499_v1  ;;  %v474_v26 = vsub.f32 %v1092_v56, %v458_v7  ;;  %535 = vadd.xlane.f32.xlu0 %v1171_v8  ;;  %v436_v56 = vpop.xlane.xlu0 %435 }
 0x203   :  { %v426_v9 = vpop.xlane.xlu1 %425  ;;  %v511_v37 = vmul.f32 1.442695, %v482_v21 }
 0x204   :  { %v872_v52 = vpop.eup %871  ;;  %v495_v11 = vmul.f32 1.442695, %v474_v26  ;;  %vm447_vm2 = vcmp.gt.f32.partialorder %v426_v9, -inf }
 0x205   :  { %v463_v12 = vsel %vm447_vm2, %v426_v9, 0.0  ;;  %v1178_v13 = vsel %vm363_vm4, %v872_v52, 0.0  ;;  %vm452_vm4 = vcmp.gt.f32.partialorder %v436_v56, -inf }
 0x206   :  { %877 = vpow2.f32 %v495_v11  ;;  %v479_v27 = vsub.f32 %v1104_v59, %v463_v12  ;;  %545 = vadd.xlane.f32.xlu1 %v1178_v13  ;;  %v468_v23 = vsel %vm452_vm4, %v436_v56, 0.0 }
 0x207   :  { %v428_v14 = vpop.xlane.xlu1 %427  ;;  %v484_v34 = vsub.f32 %v1100_v58, %v468_v23 }
 0x208   :  { %v874_v15 = vpop.eup %873  ;;  %v505_v17 = vmul.f32 1.442695, %v479_v27  ;;  %vm448_vm3 = vcmp.gt.f32.partialorder %v428_v14, -inf }
 0x209   :  { %v464_v18 = vsel %vm448_vm3, %v428_v14, 0.0  ;;  %v1184_v19 = vsel %vm361_vm6, %v874_v15, 0.0  ;;  %v515_v51 = vmul.f32 1.442695, %v484_v34 }
 0x20a   :  { %879 = vpow2.f32 %v505_v17  ;;  %v480_v31 = vsub.f32 %v1120_v0, %v464_v18  ;;  %541 = vadd.xlane.f32.xlu1 %v1184_v19 }
 0x20b   :  { %v424_v59 = vpop.xlane.xlu1 %423  ;;  %881 = vpow2.f32 %v501_v16 }
 0x20c   :  { %v876_v20 = vpop.eup %875  ;;  %v507_v22 = vmul.f32 1.442695, %v480_v31  ;;  %vm446_vm8 = vcmp.gt.f32.partialorder %v424_v59, -inf }
 0x20d   :  { %v462_v28 = vsel %vm446_vm8, %v424_v59, 0.0  ;;  %v1191_v32 = vsel %vm364_vm7, %v876_v20, 0.0 }
 0x20e   :  { %883 = vpow2.f32 %v507_v22  ;;  %v478_v29 = vsub.f32 %v1127_v2, %v462_v28  ;;  %547 = vadd.xlane.f32.xlu0 %v1191_v32 }
 0x20f   :  { %v430_v0 = vpop.xlane.xlu1 %429 }
 0x210   :  { %v878_v33 = vpop.eup %877  ;;  %v503_v42 = vmul.f32 1.442695, %v478_v29  ;;  %vm449_vm6 = vcmp.gt.f32.partialorder %v430_v0, -inf }
 0x211   :  { %v465_v57 = vsel %vm449_vm6, %v430_v0, 0.0  ;;  %v1198_v45 = vsel %vm362_vm9, %v878_v33, 0.0  ;;  %vm1318_vm9 = vcmp.ne.f32.partialorder %v1075_v50, 0.0 }
 0x212   :  { %885 = vpow2.f32 %v503_v42  ;;  %v481_v35 = vsub.f32 %v1134_v4, %v465_v57  ;;  %543 = vadd.xlane.f32.xlu0 %v1198_v45 }
 0x213   :  { %v434_v2 = vpop.xlane.xlu1 %433  ;;  %887 = vpow2.f32 %v511_v37 }
 0x214   :  { %v880_v48 = vpop.eup %879  ;;  %v509_v24 = vmul.f32 1.442695, %v481_v35  ;;  %vm451_vm7 = vcmp.gt.f32.partialorder %v434_v2, -inf }
 0x215   :  { %v467_v55 = vsel %vm451_vm7, %v434_v2, 0.0  ;;  %v1204_v58 = vsel %vm367_vm11, %v880_v48, 0.0  ;;  %v882_v60 = vpop.eup %881  ;;  %vm1319_vm11 = vcmp.ne.f32.partialorder %v1083_v53, 0.0 }
 0x216   :  { %889 = vpow2.f32 %v509_v24  ;;  %v483_v36 = vsub.f32 %v1141_v6, %v467_v55  ;;  %553 = vadd.xlane.f32.xlu1 %v1204_v58  ;;  %v1210_v61 = vsel %vm365_vm5, %v882_v60, 0.0  ;;  %vm1317_vm5 = vcmp.ne.f32.partialorder %v1086_v54, 0.0 }
 0x217   :  { %891 = vpow2.f32 %v515_v51 }
 0x218   :  { %v884_v4 = vpop.eup %883  ;;  %v513_v39 = vmul.f32 1.442695, %v483_v36 }
 0x219   :  { %v1214_v25 = vsel %vm368_vm12, %v884_v4, 0.0  ;;  %vm1320_vm12 = vcmp.ne.f32.partialorder %v1073_v49, 0.0 }
 0x21a   :  { %893 = vpow2.f32 %v513_v39  ;;  %549 = vadd.xlane.f32.xlu1 %v1210_v61  ;;  %555 = vadd.xlane.f32.xlu0 %v1214_v25 }
 0x21c   :  { %v886_v40 = vpop.eup %885 }
 0x21d   :  { %v1220_v6 = vsel %vm366_vm13, %v886_v40, 0.0  ;;  %v888_v63 = vpop.eup %887 }
 0x21e   :  { %551 = vadd.xlane.f32.xlu0 %v1220_v6  ;;  %v1225_v47 = vsel %vm1317_vm5, %v888_v63, 0.0 }
 0x220   :  { %v890_v41 = vpop.eup %889 }
 0x221   :  { %v1229_v43 = vsel %vm1318_vm9, %v890_v41, 0.0  ;;  %v892_v1 = vpop.eup %891 }
 0x222   :  { %559 = vadd.xlane.f32.xlu0 %v1225_v47  ;;  %557 = vadd.xlane.f32.xlu1 %v1229_v43  ;;  %v1235_v3 = vsel %vm1319_vm11, %v892_v1, 0.0 }
 0x224   :  { %v894_v44 = vpop.eup %893 }
 0x225   :  { %v1239_v5 = vsel %vm1320_vm12, %v894_v44, 0.0 }
 0x226   :  { %563 = vadd.xlane.f32.xlu0 %v1235_v3  ;;  %561 = vadd.xlane.f32.xlu1 %v1239_v5 }
 0x283   :  { %v538_v50 = vpop.xlane.xlu1 %537 }
 0x284   :  { %vm567_vm13 = vcmp.eq.f32.partialorder %v538_v50, 0.0 }
 0x285   :  { %v583_v54 = vsel %vm567_vm13, 1.0, %v538_v50 }
 0x286   :  { %895 = vrcp.f32 %v583_v54 }
 0x287   :  { %v534_v7 = vpop.xlane.xlu1 %533 }
 0x288   :  { %vm565_vm10 = vcmp.eq.f32.partialorder %v534_v7, 0.0 }
 0x289   :  { %v581_v26 = vsel %vm565_vm10, 1.0, %v534_v7 }
 0x28a   :  { %897 = vrcp.f32 %v581_v26 }
 0x28b   :  { %v540_v9 = vpop.xlane.xlu0 %539 }
 0x28c   :  { %vm568_vm0 = vcmp.eq.f32.partialorder %v540_v9, 0.0 }
 0x28d   :  { %v584_v53 = vsel %vm568_vm0, 1.0, %v540_v9 }
 0x28e   :  { %899 = vrcp.f32 %v584_v53 }
 0x28f   :  { %v536_v52 = vpop.xlane.xlu0 %535 }
 0x290   :  { %v896_v49 = vpop.eup %895  ;;  %vm566_vm14 = vcmp.eq.f32.partialorder %v536_v52, 0.0 }
 0x291   :  { %v615_v10 = vmul.f32 %v896_v49, %v583_v54  ;;  %v582_v11 = vsel %vm566_vm14, 1.0, %v536_v52 }
 0x292   :  { %901 = vrcp.f32 %v582_v11 }
 0x293   :  { %v631_v12 = vsub.f32 2.0, %v615_v10  ;;  %v546_v27 = vpop.xlane.xlu1 %545 }
 0x294   :  { %v898_v56 = vpop.eup %897  ;;  %vm571_vm1 = vcmp.eq.f32.partialorder %v546_v27, 0.0 }
 0x295   :  { %v647_v14 = vmul.f32 %v896_v49, %v631_v12  ;;  %v613_v15 = vmul.f32 %v898_v56, %v581_v26  ;;  %v587_v16 = vsel %vm571_vm1, 1.0, %v546_v27 }
 0x296   :  { %903 = vrcp.f32 %v587_v16 }
 0x297   :  { %v663_v17 = vmul.f32 %v647_v14, %v583_v54  ;;  %v629_v46 = vsub.f32 2.0, %v613_v15  ;;  %v542_v18 = vpop.xlane.xlu1 %541 }
 0x298   :  { %v900_v31 = vpop.eup %899  ;;  %vm569_vm2 = vcmp.eq.f32.partialorder %v542_v18, 0.0 }
 0x299   :  { %v679_v59 = vsub.f32 2.0, %v663_v17  ;;  %v645_v20 = vmul.f32 %v898_v56, %v629_v46  ;;  %v616_v21 = vmul.f32 %v900_v31, %v584_v53  ;;  %v585_v22 = vsel %vm569_vm2, 1.0, %v542_v18 }
 0x29a   :  { %905 = vrcp.f32 %v585_v22 }
 0x29b   :  { %v695_v23 = vmul.f32 %v679_v59, %v647_v14  ;;  %v661_v28 = vmul.f32 %v645_v20, %v581_v26  ;;  %v632_v29 = vsub.f32 2.0, %v616_v21  ;;  %v548_v0 = vpop.xlane.xlu0 %547 }
 0x29c   :  { %v902_v33 = vpop.eup %901  ;;  %vm572_vm15 = vcmp.eq.f32.partialorder %v548_v0, 0.0 }
 0x29d   :  { %v711_v37 = vmul.f32 %v695_v23, %v1153_v30  ;;  %v677_v34 = vsub.f32 2.0, %v661_v28  ;;  %v648_v42 = vmul.f32 %v900_v31, %v632_v29  ;;  %v614_v57 = vmul.f32 %v902_v33, %v582_v11 }
 0x29e   :  { %v588_v35 = vsel %vm572_vm15, 1.0, %v548_v0 }
 0x29f   :  { %727 = vst [vmem:[#allocation5 + $0x10] sm:$0xff] %v711_v37  ;;  %v693_v2 = vmul.f32 %v677_v34, %v645_v20  ;;  %v664_v48 = vmul.f32 %v648_v42, %v584_v53  ;;  %v630_v51 = vsub.f32 2.0, %v614_v57  ;;  %907 = vrcp.f32 %v588_v35  ;;  %v544_v24 = vpop.xlane.xlu0 %543 }
 0x2a0   :  { %v904_v55 = vpop.eup %903  ;;  %vm570_vm3 = vcmp.eq.f32.partialorder %v544_v24, 0.0 }
 0x2a1   :  { %v709_v60 = vmul.f32 %v693_v2, %v1159_v38  ;;  %v680_v36 = vsub.f32 2.0, %v664_v48  ;;  %v646_v4 = vmul.f32 %v902_v33, %v630_v51  ;;  %v619_v39 = vmul.f32 %v904_v55, %v587_v16 }
 0x2a2   :  { %v1245_v40 = vsel %vm570_vm3, 1.0, %v544_v24 }
 0x2a3   :  { %725 = vst [vmem:[#allocation5] sm:$0xff] %v709_v60  ;;  %v696_v30 = vmul.f32 %v680_v36, %v648_v42  ;;  %v662_v63 = vmul.f32 %v646_v4, %v582_v11  ;;  %v635_v41 = vsub.f32 2.0, %v619_v39  ;;  %909 = vrcp.f32 %v1245_v40  ;;  %v554_v1 = vpop.xlane.xlu1 %553 }
 0x2a4   :  { %v906_v44 = vpop.eup %905  ;;  %vm575_vm4 = vcmp.eq.f32.partialorder %v554_v1, 0.0 }
 0x2a5   :  { %v712_v50 = vmul.f32 %v696_v30, %v1165_v62  ;;  %v678_v54 = vsub.f32 2.0, %v662_v63  ;;  %v651_v7 = vmul.f32 %v904_v55, %v635_v41  ;;  %v617_v26 = vmul.f32 %v906_v44, %v585_v22 }
 0x2a6   :  { %v1249_v38 = vsel %vm575_vm4, 1.0, %v554_v1 }
 0x2a7   :  { %728 = vst [vmem:[#allocation5 + $0x18] sm:$0xff] %v712_v50  ;;  %v694_v9 = vmul.f32 %v678_v54, %v646_v4  ;;  %v667_v53 = vmul.f32 %v651_v7, %v587_v16  ;;  %v633_v52 = vsub.f32 2.0, %v617_v26  ;;  %911 = vrcp.f32 %v1249_v38  ;;  %v556_v49 = vpop.xlane.xlu0 %555  ;;  %v550_v10 = vpop.xlane.xlu1 %549 }
 0x2a8   :  { %vm576_vm8 = vcmp.eq.f32.partialorder %v556_v49, 0.0  ;;  %vm573_vm6 = vcmp.eq.f32.partialorder %v550_v10, 0.0 }
 0x2a9   :  { %v908_v11 = vpop.eup %907  ;;  %v710_v12 = vmul.f32 %v694_v9, %v1171_v8  ;;  %v683_v27 = vsub.f32 2.0, %v667_v53  ;;  %v649_v62 = vmul.f32 %v906_v44, %v633_v52  ;;  %v1253_v56 = vsel %vm576_vm8, 1.0, %v556_v49 }
 0x2aa   :  { %v620_v14 = vmul.f32 %v908_v11, %v588_v35  ;;  %913 = vrcp.f32 %v1253_v56  ;;  %v1256_v15 = vsel %vm573_vm6, 1.0, %v550_v10 }
 0x2ab   :  { %726 = vst [vmem:[#allocation5 + $0x8] sm:$0xff] %v710_v12  ;;  %v699_v16 = vmul.f32 %v683_v27, %v651_v7  ;;  %v665_v17 = vmul.f32 %v649_v62, %v585_v22  ;;  %915 = vrcp.f32 %v1256_v15  ;;  %v552_v46 = vpop.xlane.xlu0 %551 }
 0x2ac   :  { %v636_v18 = vsub.f32 2.0, %v620_v14  ;;  %vm574_vm7 = vcmp.eq.f32.partialorder %v552_v46, 0.0 }
 0x2ad   :  { %v910_v31 = vpop.eup %909  ;;  %v715_v8 = vmul.f32 %v699_v16, %v1178_v13  ;;  %v681_v59 = vsub.f32 2.0, %v665_v17  ;;  %v1260_v20 = vsel %vm574_vm7, 1.0, %v552_v46 }
 0x2ae   :  { %v652_v21 = vmul.f32 %v908_v11, %v636_v18  ;;  %v618_v23 = vmul.f32 %v910_v31, %v1245_v40  ;;  %917 = vrcp.f32 %v1260_v20 }
 0x2af   :  { %731 = vst [vmem:[#allocation5 + $0x30] sm:$0xff] %v715_v8  ;;  %v697_v28 = vmul.f32 %v681_v59, %v649_v62  ;;  %v560_v29 = vpop.xlane.xlu0 %559  ;;  %v558_v22 = vpop.xlane.xlu1 %557 }
 0x2b0   :  { %v668_v0 = vmul.f32 %v652_v21, %v588_v35  ;;  %v634_v33 = vsub.f32 2.0, %v618_v23  ;;  %vm578_vm5 = vcmp.eq.f32.partialorder %v560_v29, 0.0  ;;  %vm577_vm9 = vcmp.eq.f32.partialorder %v558_v22, 0.0 }
 0x2b1   :  { %v912_v37 = vpop.eup %911  ;;  %v713_v34 = vmul.f32 %v697_v28, %v1184_v19  ;;  %v1265_v13 = vsel %vm578_vm5, 1.0, %v560_v29  ;;  %v1267_v42 = vsel %vm577_vm9, 1.0, %v558_v22 }
 0x2b2   :  { %v684_v57 = vsub.f32 2.0, %v668_v0  ;;  %v650_v2 = vmul.f32 %v910_v31, %v634_v33  ;;  %v623_v48 = vmul.f32 %v912_v37, %v1249_v38  ;;  %919 = vrcp.f32 %v1265_v13 }
 0x2b3   :  { %729 = vst [vmem:[#allocation5 + $0x20] sm:$0xff] %v713_v34  ;;  %921 = vrcp.f32 %v1267_v42  ;;  %v564_v35 = vpop.xlane.xlu0 %563  ;;  %v562_v51 = vpop.xlane.xlu1 %561 }
 0x2b4   :  { %v914_v24 = vpop.eup %913  ;;  %v700_v55 = vmul.f32 %v684_v57, %v652_v21  ;;  %v666_v60 = vmul.f32 %v650_v2, %v1245_v40  ;;  %v639_v19 = vsub.f32 2.0, %v623_v48  ;;  %vm580_vm11 = vcmp.eq.f32.partialorder %v564_v35, 0.0 }
 0x2b5   :  { %v916_v36 = vpop.eup %915  ;;  %v624_v4 = vmul.f32 %v914_v24, %v1253_v56  ;;  %v1274_v39 = vsel %vm580_vm11, 1.0, %v564_v35  ;;  %vm579_vm12 = vcmp.eq.f32.partialorder %v562_v51, 0.0 }
 0x2b6   :  { %v716_v30 = vmul.f32 %v700_v55, %v1191_v32  ;;  %v682_v63 = vsub.f32 2.0, %v666_v60  ;;  %v655_v41 = vmul.f32 %v912_v37, %v639_v19  ;;  %v621_v1 = vmul.f32 %v916_v36, %v1256_v15 }
 0x2b7   :  { %v640_v44 = vsub.f32 2.0, %v624_v4  ;;  %923 = vrcp.f32 %v1274_v39  ;;  %v595_v50 = vsel %vm579_vm12, 1.0, %v562_v51 }
 0x2b8   :  { %v918_v54 = vpop.eup %917  ;;  %732 = vst [vmem:[#allocation5 + $0x38] sm:$0xff] %v716_v30  ;;  %v698_v40 = vmul.f32 %v682_v63, %v650_v2  ;;  %v671_v7 = vmul.f32 %v655_v41, %v1249_v38  ;;  %v637_v26 = vsub.f32 2.0, %v621_v1  ;;  %925 = vrcp.f32 %v595_v50 }
 0x2b9   :  { %v656_v9 = vmul.f32 %v914_v24, %v640_v44  ;;  %v622_v53 = vmul.f32 %v918_v54, %v1260_v20 }
 0x2ba   :  { %v714_v32 = vmul.f32 %v698_v40, %v1198_v45  ;;  %v687_v52 = vsub.f32 2.0, %v671_v7  ;;  %v653_v49 = vmul.f32 %v916_v36, %v637_v26 }
 0x2bb   :  { %v672_v10 = vmul.f32 %v656_v9, %v1253_v56  ;;  %v638_v11 = vsub.f32 2.0, %v622_v53 }
 0x2bc   :  { %v920_v12 = vpop.eup %919  ;;  %730 = vst [vmem:[#allocation5 + $0x28] sm:$0xff] %v714_v32  ;;  %v703_v27 = vmul.f32 %v687_v52, %v655_v41  ;;  %v669_v62 = vmul.f32 %v653_v49, %v1256_v15 }
 0x2bd   :  { %v922_v14 = vpop.eup %921  ;;  %v688_v16 = vsub.f32 2.0, %v672_v10  ;;  %v654_v38 = vmul.f32 %v918_v54, %v638_v11  ;;  %v626_v17 = vmul.f32 %v920_v12, %v1265_v13 }
 0x2be   :  { %v719_v46 = vmul.f32 %v703_v27, %v1204_v58  ;;  %v685_v18 = vsub.f32 2.0, %v669_v62  ;;  %v625_v45 = vmul.f32 %v922_v14, %v1267_v42 }
 0x2bf   :  { %v704_v31 = vmul.f32 %v688_v16, %v656_v9  ;;  %v670_v8 = vmul.f32 %v654_v38, %v1260_v20  ;;  %v642_v56 = vsub.f32 2.0, %v626_v17 }
 0x2c0   :  { %735 = vst [vmem:[#allocation5 + $0x50] sm:$0xff] %v719_v46  ;;  %v701_v59 = vmul.f32 %v685_v18, %v653_v49  ;;  %v641_v21 = vsub.f32 2.0, %v625_v45 }
 0x2c1   :  { %v924_v23 = vpop.eup %923  ;;  %v720_v15 = vmul.f32 %v704_v31, %v1214_v25  ;;  %v686_v28 = vsub.f32 2.0, %v670_v8  ;;  %v658_v29 = vmul.f32 %v920_v12, %v642_v56 }
 0x2c2   :  { %v926_v22 = vpop.eup %925  ;;  %v717_v0 = vmul.f32 %v701_v59, %v1210_v61  ;;  %v657_v33 = vmul.f32 %v922_v14, %v641_v21  ;;  %v628_v58 = vmul.f32 %v924_v23, %v1274_v39 }
 0x2c3   :  { %736 = vst [vmem:[#allocation5 + $0x58] sm:$0xff] %v720_v15  ;;  %v702_v37 = vmul.f32 %v686_v28, %v654_v38  ;;  %v674_v34 = vmul.f32 %v658_v29, %v1265_v13  ;;  %v627_v20 = vmul.f32 %v926_v22, %v595_v50 }
 0x2c4   :  { %733 = vst [vmem:[#allocation5 + $0x40] sm:$0xff] %v717_v0  ;;  %v673_v57 = vmul.f32 %v657_v33, %v1267_v42  ;;  %v644_v2 = vsub.f32 2.0, %v628_v58 }
 0x2c5   :  { %v718_v48 = vmul.f32 %v702_v37, %v1220_v6  ;;  %v690_v25 = vsub.f32 2.0, %v674_v34  ;;  %v643_v35 = vsub.f32 2.0, %v627_v20 }
 0x2c6   :  { %v689_v51 = vsub.f32 2.0, %v673_v57  ;;  %v660_v24 = vmul.f32 %v924_v23, %v644_v2 }
 0x2c7   :  { %734 = vst [vmem:[#allocation5 + $0x48] sm:$0xff] %v718_v48  ;;  %v706_v61 = vmul.f32 %v690_v25, %v658_v29  ;;  %v659_v55 = vmul.f32 %v926_v22, %v643_v35 }
 0x2c8   :  { %v705_v60 = vmul.f32 %v689_v51, %v657_v33  ;;  %v676_v19 = vmul.f32 %v660_v24, %v1274_v39 }
 0x2c9   :  { %v722_v36 = vmul.f32 %v706_v61, %v1225_v47  ;;  %v675_v13 = vmul.f32 %v659_v55, %v595_v50 }
 0x2ca   :  { %v721_v4 = vmul.f32 %v705_v60, %v1229_v43  ;;  %v692_v30 = vsub.f32 2.0, %v676_v19 }
 0x2cb   :  { %738 = vst [vmem:[#allocation5 + $0x68] sm:$0xff] %v722_v36  ;;  %v691_v42 = vsub.f32 2.0, %v675_v13 }
 0x2cc   :  { %737 = vst [vmem:[#allocation5 + $0x60] sm:$0xff] %v721_v4  ;;  %v708_v6 = vmul.f32 %v692_v30, %v660_v24 }
 0x2cd   :  { %v707_v63 = vmul.f32 %v691_v42, %v659_v55 }
 0x2ce   :  { %v724_v41 = vmul.f32 %v708_v6, %v1235_v3 }
 0x2cf   :  { %v723_v1 = vmul.f32 %v707_v63, %v1239_v5 }
 0x2d0   :  { %740 = vst [vmem:[#allocation5 + $0x78] sm:$0xff] %v724_v41 }
 0x2d1   :  { %739 = vst [vmem:[#allocation5 + $0x70] sm:$0xff] %v723_v1 }
 0x2d2   :  { %960 = shalt.err (!%p957_p12)
}
 0x2d3   :  { %s961_s24 = scalar_lea.hbm %s1312_s1, 2048 }
 0x2d4   :  { %p962_p13 = scmp.ne.s32.totalorder %s1312_s1, %s961_s24  ;;  %p965_p0 = scmp.lt.u32.totalorder %s961_s24, %s1312_s1 }
 0x2d6   :  { %p967_p1 = pnand %p965_p0, %p962_p13 }
 0x2d8   :  { %970 = shalt.err (!%p967_p1)
}
 0x2d9   :  { %s979_s29 = smov 128   ;;  %s980_s30 = smov 8  }
 0x2da   :  { %752 = dma.vmem_to_hbm [thread:$0]  %s747_s20, 2048, %s1312_s1, [#allocation4], %s979_s29, %s979_s29, %s980_s30  }
 0x2db   :  { %973 = dma.done.wait [#allocation4], 2048  }
 0x2dc   :  { %974 = vsyncadd [#allocation4], 4294965248 }
 0x2dd   :  { %756 = vsyncpa [#allocation3], 1 }
 0x2de   :  { %757 = vsyncpa [#allocation4], 1 }

</bundles_post_ra>
